<compile_context>
chip_gen: v5e
topology: v5e:2x2
jax: 0.10.0
libtpu: 0.0.40
codegen_flags: <defaults>
</compile_context>

<pallas_src>
import jax
import jax.numpy as jnp
from jax.experimental import pallas as pl
from jax.experimental.pallas import tpu as pltpu


def _round_up(x: int, m: int) -> int:
    return ((x + m - 1) // m) * m


def _chomp_copy_kernel(x_ref, o_ref):
    # Rows-only path: input block has round_up(L_out, 128) columns, output
    # block has exactly L_out -> static slice of the kept columns.
    # L-tiled path: input block == output block -> whole-tile copy (slice is a
    # no-op).
    # NOTE (ragged last block): the input block may include chomped / padded
    # columns; Pallas masks the corresponding out-of-range output writes, so
    # nothing is stored past L_out.  Do not replace this with an unmasked
    # pltpu.store to the full block.
    o_ref[...] = x_ref[:, : o_ref.shape[-1]]


# ~2-4 MiB per block keeps per-grid-step overhead negligible on all chips
# while the double-buffered total stays far below v7x's 64 MiB VMEM.
_TARGET_BLOCK_BYTES = 4 * 1024 * 1024


def chomp1d(x: jax.Array, chomp_size: int, *, block_bytes: int = _TARGET_BLOCK_BYTES) -> jax.Array:
    """Pallas equivalent of Chomp1d(chomp_size)(x) for x of shape (N, C, L)."""
    n, c, l = x.shape
    assert 0 <= chomp_size < l, "chomp_size must be in [0, L)"
    if chomp_size == 0:
        # Intent of the module is identity when there is nothing to chomp.
        return x
    l_out = l - chomp_size

    # Tiny outputs: Pallas launch + masked (<128-lane) stores are pure
    # overhead; XLA's slice is at least as fast and fuses into the consumer.
    if l_out < 128:
        return jax.lax.slice(x, (0, 0, 0), (n, c, l_out))

    # Flatten (N, C) -> rows: lane-dense last dim, plenty of grid steps.
    r = n * c
    x2 = x.reshape(r, l)

    itemsize = jnp.dtype(x.dtype).itemsize
    pack = max(8, 32 // itemsize)       # sublane pack: 8 f32 / 16 bf16 / 32 int8
    l_cols = _round_up(l_out, 128)      # 128-aligned input window over kept columns

    if pack * l_cols * itemsize <= block_bytes:
        # Rows-only grid: output block spans the full L_out extent, so the
        # output DMA is contiguous and stores are lane-dense / unmasked.
        rows_budget = max(pack, (block_bytes // (l_cols * itemsize)) // pack * pack)
        rows_parallel = _round_up(pl.cdiv(r, 8), pack)   # aim for >=8 steps (v7x megacore)
        r_tile = max(pack, min(rows_budget, rows_parallel, _round_up(r, pack)))
        grid = (pl.cdiv(r, r_tile),)
        in_spec = pl.BlockSpec((r_tile, l_cols), lambda i: (i, 0))
        out_spec = pl.BlockSpec((r_tile, l_out), lambda i: (i, 0))
        in_block_bytes = r_tile * l_cols * itemsize
        out_block_bytes = r_tile * l_out * itemsize
    else:
        # Very long sequences: tile L as well. Identical block indices for
        # input and output, so beyond the 128-column alignment slack the
        # chomped tail is never DMA'd from HBM.
        r_tile = max(pack, min(256, _round_up(r, pack)))
        l_tile = max(128, min(l_cols, (block_bytes // (r_tile * itemsize)) // 128 * 128))
        grid = (pl.cdiv(r, r_tile), pl.cdiv(l_out, l_tile))
        in_spec = pl.BlockSpec((r_tile, l_tile), lambda i, j: (i, j))
        out_spec = pl.BlockSpec((r_tile, l_tile), lambda i, j: (i, j))
        in_block_bytes = r_tile * l_tile * itemsize
        out_block_bytes = in_block_bytes

    # Explicit VMEM budget: double-buffered input + output blocks, with headroom.
    vmem_limit = max(int(2 * (in_block_bytes + out_block_bytes) * 1.5), 4 * 1024 * 1024)

    cost = pl.CostEstimate(
        flops=0,
        transcendentals=0,
        bytes_accessed=2 * r * l_out * itemsize,   # read kept columns + write them
    )

    out2 = pl.pallas_call(
        _chomp_copy_kernel,
        out_shape=jax.ShapeDtypeStruct((r, l_out), x.dtype),
        grid_spec=pltpu.PrefetchScalarGridSpec(
            num_scalar_prefetch=0,
            grid=grid,
            in_specs=[in_spec],
            out_specs=out_spec,
        ),
        compiler_params=pltpu.CompilerParams(
            dimension_semantics=("parallel",) * len(grid),
            vmem_limit_bytes=vmem_limit,
        ),
        cost_estimate=cost,
    )(x2)

    return out2.reshape(n, c, l_out)


if __name__ == "__main__":
    key = jax.random.PRNGKey(0)
    k1, k2 = jax.random.split(key)

    # Test 1: tiny module-scale shape (N=2, C=4, L=16) -> lax.slice fallback.
    x_small = jax.random.normal(k1, (2, 4, 16), dtype=jnp.float32)
    out_small = jax.block_until_ready(chomp1d(x_small, 3))
    assert out_small.shape == (2, 4, 13), out_small.shape
    assert jnp.array_equal(out_small, x_small[:, :, :-3]), "mismatch (fallback path)"

    # chomp_size == 0 -> identity.
    out_id = jax.block_until_ready(chomp1d(x_small, 0))
    assert jnp.array_equal(out_id, x_small), "mismatch (chomp_size=0)"

    # Test 2: Pallas rows-only fast path (L_out = 273 >= 128, contiguous
    # full-L_out output blocks, input window rounded up to 384 columns).
    x_big = jax.random.normal(k2, (2, 4, 300), dtype=jnp.float32)
    out_big = jax.block_until_ready(chomp1d(x_big, 27))
    assert out_big.shape == (2, 4, 273), out_big.shape
    assert jnp.array_equal(out_big, x_big[:, :, :-27]), "mismatch (rows-only path)"

    # Test 3: force the L-tiled path (tiny block budget) on the same data to
    # exercise the ragged-last-block masked-store behavior.
    out_tiled = jax.block_until_ready(chomp1d(x_big, 27, block_bytes=1024))
    assert jnp.array_equal(out_tiled, x_big[:, :, :-27]), "mismatch (L-tiled path)"

    print("KERNEL_OK")
</pallas_src>

<mosaic_0001>
module attributes {stable_mosaic.version = 11 : i64} {
  func.func @_chomp_copy_kernel(%arg0: i32, %arg1: memref<8x384xf32, #tpu.memory_space<vmem>>, %arg2: memref<8x273xf32, #tpu.memory_space<vmem>>) attributes {dimension_semantics = [#tpu.dimension_semantics<parallel>], iteration_bounds = array<i64: 1>, scalar_prefetch = 0 : i64, scratch_operands = 0 : i64, tpu.core_type = #tpu.core_type<tc>, window_params = [{transform_indices = @transform_0, window_bounds = array<i64: 8, 384>}, {transform_indices = @transform_1, window_bounds = array<i64: 8, 273>}]} {
    %c0 = arith.constant 0 : index
    %c0_0 = arith.constant 0 : index
    %0 = vector.load %arg1[%c0, %c0_0] : memref<8x384xf32, #tpu.memory_space<vmem>>, vector<8x273xf32>
    %c0_1 = arith.constant 0 : index
    %c0_2 = arith.constant 0 : index
    %1 = vector.load %arg2[%c0_1, %c0_2] : memref<8x273xf32, #tpu.memory_space<vmem>>, vector<8x273xf32>
    tpu.vector_store %arg2[%c0_1, %c0_2], %0 {strides = array<i32>} : memref<8x273xf32, #tpu.memory_space<vmem>>, vector<8x273xf32>,
    return
  }
  func.func @transform_0(%arg0: i32) -> (i32, i32) {
    %c0_i32 = arith.constant 0 : i32
    %c0_i32_0 = arith.constant 0 : i32
    return %arg0, %c0_i32 : i32, i32
  }
  func.func @transform_1(%arg0: i32) -> (i32, i32) {
    %c0_i32 = arith.constant 0 : i32
    %c0_i32_0 = arith.constant 0 : i32
    return %arg0, %c0_i32 : i32, i32
  }
}

</mosaic_0001>

<bundles_post_ra>
// kernel: tpu_custom_call.1
= control target key start
LH: loop header
LB: loop body
LE: loop exit
PB: predicated region body
PF: predicated region fallthrough
CT: control target
= control target key end

     0   :  { %6 = vsyncpa [#allocation3], 0  ;;  %s119_s0 = inlined_call_operand.hbm [shape: f32[8,300], index: 0, kind: input, shape index: {}]   ;;  %s120_s1 = inlined_call_operand.hbm [shape: f32[8,273], index: 1, kind: output, shape index: {}]  }
   0x1   :  { %7 = vsyncpa [#allocation4], 0  ;;  %s13_s8 = sshll.u32 %s119_s0, 4  ;;  %s101_s9 = smov [#allocation2]   ;;  %s14_s8 = int_to_ptr.hbm [resolvable:$true] %s13_s8 }
   0x2   :  { %s15_s10 = sshll.u32 %s101_s9, 4  ;;  %s16_s10 = int_to_ptr.vmem [resolvable:$true] %s15_s10 }
   0x3   :  { %18 = dma.hbm_to_vmem [thread:$0]  %s14_s8, 384, %s16_s10, [#allocation3]  }
   0x4   :  { %97 = dma.done.wait [#allocation3], 384  }
   0x5   :  { %98 = vsyncadd [#allocation3], 4294966912  ;;  %s102_s11 = smov [#allocation5]   ;;  %s37_s15 = sshll.u32 %s120_s1, 4  ;;  %v23_v0 = vld [vmem:[#allocation2] sm:$0xff]  ;;  %v24_v1 = vld [vmem:[#allocation2 + $0x8] sm:$0xff]  ;;  %s38_s15 = int_to_ptr.hbm [resolvable:$true] %s37_s15 }
   0x6   :  { %s35_s12 = sshll.u32 %s102_s11, 4  ;;  %v25_v2 = vld [vmem:[#allocation2 + $0x10] sm:$0xff]  ;;  %vm28_vm0 = vcmask 138240   ;;  %26 = vst [vmem:[#allocation5] sm:$0xff] %v23_v0  ;;  %s36_s12 = int_to_ptr.vmem [resolvable:$true] %s35_s12 }
   0x7   :  { %27 = vst [vmem:[#allocation5 + $0x8] sm:$0xff] %v24_v1 }
   0x8   :  { %29 = vst.msk [vmem:[#allocation5 + $0x10] sm:$0xff] %vm28_vm0, %v25_v2 }
   0x9   :  { %40 = dma.vmem_to_hbm [thread:$0]  %s36_s12, 384, %s38_s15, [#allocation4]  }
   0xa   :  { %99 = dma.done.wait [#allocation4], 384  }
   0xb   :  { %100 = vsyncadd [#allocation4], 4294966912 }
   0xc   :  { %45 = vsyncpa [#allocation3], 1 }
   0xd   :  { %46 = vsyncpa [#allocation4], 1 }

</bundles_post_ra>
